<compile_context>
chip_gen: v6e
topology: v6e:2x2x1
jax: 0.10.0
libtpu: 0.0.40
codegen_flags: <defaults>
</compile_context>

<pallas_src>
import functools

import jax
import jax.numpy as jnp
from jax.experimental import pallas as pl
from jax.experimental.pallas import tpu as pltpu

EPS = 1e-6
LANE = 128
SUBLANE = 8
MAX_TILE_ROWS = 2048


def _cdiv(a, b):
    return -(-a // b)


def _round_up(a, b):
    return _cdiv(a, b) * b


def _r2_loss_kernel(preds_ref, labels_ref, out_ref,
                    acc_l_ref, acc_l2_ref, acc_res_ref, *, n_elems):
    """Streaming reduction: per-step (tile_rows,128) -> (8,128) partials."""
    c = pl.program_id(0)          # parallel axis (TensorCore half)
    k = pl.program_id(1)          # reduction axis (streaming steps)
    steps = pl.num_programs(1)

    @pl.when(k == 0)
    def _init():
        acc_l_ref[...] = jnp.zeros_like(acc_l_ref)
        acc_l2_ref[...] = jnp.zeros_like(acc_l2_ref)
        acc_res_ref[...] = jnp.zeros_like(acc_res_ref)

    # Cast in-kernel so low-precision inputs travel over HBM at half width.
    l = labels_ref[...].astype(jnp.float32)
    p = preds_ref[...].astype(jnp.float32)
    tile_rows = l.shape[0]
    block_elems = tile_rows * LANE

    # Layout-preserving split of the sublane axis into (slabs, 8, 128).
    l3 = l.reshape(-1, SUBLANE, LANE)
    p3 = p.reshape(-1, SUBLANE, LANE)
    d = p3 - l3 + EPS

    # Global element offset of this block. n_elems is a static Python int
    # (int32 arithmetic is fine for any realistic loss-input size).
    base = (c * steps + k) * block_elems
    has_tail = base + block_elems > n_elems   # block overlaps end of data

    @pl.when(jnp.logical_not(has_tail))
    def _full_block():
        # Pure VALU tree adds; only 3 tiny (8,128) accumulator updates/step.
        acc_l_ref[...] += jnp.sum(l3, axis=0)
        acc_l2_ref[...] += jnp.sum(l3 * l3, axis=0)
        acc_res_ref[...] += jnp.sum(d * d, axis=0)

    @pl.when(has_tail)
    def _masked_block():
        # Mask by global element index: handles lane padding, partial blocks
        # and any undefined (possibly NaN) data past the end of the array.
        i0 = jax.lax.broadcasted_iota(jnp.int32, l3.shape, 0)
        i1 = jax.lax.broadcasted_iota(jnp.int32, l3.shape, 1)
        i2 = jax.lax.broadcasted_iota(jnp.int32, l3.shape, 2)
        idx = base + (i0 * SUBLANE + i1) * LANE + i2
        valid = idx < n_elems
        zero = jnp.float32(0.0)
        acc_l_ref[...] += jnp.sum(jnp.where(valid, l3, zero), axis=0)
        acc_l2_ref[...] += jnp.sum(jnp.where(valid, l3 * l3, zero), axis=0)
        acc_res_ref[...] += jnp.sum(jnp.where(valid, d * d, zero), axis=0)

    @pl.when(k == steps - 1)
    def _write_partials():
        out_ref[0, 0, :, :] = acc_l_ref[...]
        out_ref[0, 1, :, :] = acc_l2_ref[...]
        out_ref[0, 2, :, :] = acc_res_ref[...]


def _prep(x):
    # Keep low-precision floats as-is (cast happens inside the kernel);
    # anything else is promoted to f32 once in the wrapper.
    if x.dtype not in (jnp.float32, jnp.bfloat16, jnp.float16):
        x = x.astype(jnp.float32)
    return x.reshape(-1)


def r2_loss(preds, labels):
    assert preds.shape == labels.shape
    n = preds.size                                    # static Python int

    p = _prep(preds)
    l = _prep(labels)

    # Sublane granularity required by the narrowest dtype we stream.
    sub = max(SUBLANE * max(1, 4 // p.dtype.itemsize),
              SUBLANE * max(1, 4 // l.dtype.itemsize))

    # Lane alignment. This jnp.pad (a full copy) only triggers when n is not a
    # multiple of 128; in the aligned common case the reshape below is free.
    lane_pad = (-n) % LANE
    if lane_pad:
        p = jnp.pad(p, (0, lane_pad))
        l = jnp.pad(l, (0, lane_pad))
    rows = (n + lane_pad) // LANE
    p2 = p.reshape(rows, LANE)
    l2 = l.reshape(rows, LANE)

    # Tiny-input corner: keep the (single) block inside the array extent.
    if rows < sub:
        p2 = jnp.pad(p2, ((0, sub - rows), (0, 0)))
        l2 = jnp.pad(l2, ((0, sub - rows), (0, 0)))
        rows = sub

    tile_rows = min(MAX_TILE_ROWS, _round_up(rows, sub))
    nblk = _cdiv(rows, tile_rows)

    # Split the stream in two halves for v7x's 2 TensorCores (harmless loop on
    # v5e/v6e). Keep the block count even so no block is fully out of bounds;
    # only the very last block may be partial (masked in-kernel).
    num_cores = 2 if nblk >= 2 else 1
    if num_cores == 2 and nblk % 2:
        tr = _round_up(_cdiv(rows, nblk + 1), sub)
        nb = _cdiv(rows, tr)
        if nb % 2 == 0:
            tile_rows, nblk = tr, nb
        else:
            num_cores = 1
    steps = nblk // num_cores

    kernel = functools.partial(_r2_loss_kernel, n_elems=n)

    partials = pl.pallas_call(
        kernel,
        out_shape=jax.ShapeDtypeStruct((num_cores, 3, SUBLANE, LANE),
                                       jnp.float32),
        grid=(num_cores, steps),
        in_specs=[
            pl.BlockSpec((tile_rows, LANE), lambda c, k: (c * steps + k, 0)),
            pl.BlockSpec((tile_rows, LANE), lambda c, k: (c * steps + k, 0)),
        ],
        # Per-core partial block, resident across the reduction axis, written
        # only in the last-step epilogue.
        out_specs=pl.BlockSpec((1, 3, SUBLANE, LANE),
                               lambda c, k: (c, 0, 0, 0)),
        scratch_shapes=[
            pltpu.VMEM((SUBLANE, LANE), jnp.float32),   # sum(l)
            pltpu.VMEM((SUBLANE, LANE), jnp.float32),   # sum(l*l)
            pltpu.VMEM((SUBLANE, LANE), jnp.float32),   # sum((p-l+eps)^2)
        ],
        compiler_params=pltpu.CompilerParams(
            dimension_semantics=("parallel", "arbitrary"),
            vmem_limit_bytes=32 * 1024 * 1024),
    )(p2, l2)

    # Tiny finalize in the wrapper (a few-element XLA reduction + scalar math).
    sums = jnp.sum(partials, axis=(0, 2, 3))            # -> (3,)
    sum_l, sum_l2, ss_res = sums[0], sums[1], sums[2]
    nf = jnp.float32(n)
    mean = sum_l / nf
    cshift = mean - EPS
    # Single-pass expansion of sum((l - mean + eps)^2) — algebraically exact;
    # f32 cancellation only matters when |mean(labels)| >> std(labels).
    ss_tot = sum_l2 - 2.0 * cshift * sum_l + nf * cshift * cshift
    return ss_res / ss_tot                               # = 1 - r2


def _r2_loss_ref(preds, labels):
    preds = preds.astype(jnp.float32)
    labels = labels.astype(jnp.float32)
    r2 = 1.0 - jnp.sum((preds - labels + EPS) ** 2) / jnp.sum(
        (labels - jnp.mean(labels) + EPS) ** 2)
    return 1.0 - r2


if __name__ == "__main__":
    key = jax.random.PRNGKey(0)
    k1, k2 = jax.random.split(key)
    # NCHW-like shapes: batch=2, channels=4, spatial=16x16 -> 2048 = 16*128
    preds = jax.random.normal(k1, (2, 4, 16, 16), dtype=jnp.float32)
    labels = jax.random.normal(k2, (2, 4, 16, 16), dtype=jnp.float32)

    out = jax.jit(r2_loss)(preds, labels)
    jax.block_until_ready(out)

    ref = _r2_loss_ref(preds, labels)
    assert jnp.allclose(out, ref, rtol=1e-4, atol=1e-6), (out, ref)

    print("KERNEL_OK")
</pallas_src>

<mosaic_0001>
module attributes {stable_mosaic.version = 11 : i64} {
  func.func @_r2_loss_kernel(%arg0: i32, %arg1: i32, %arg2: memref<16x128xf32, #tpu.memory_space<vmem>>, %arg3: memref<16x128xf32, #tpu.memory_space<vmem>>, %arg4: memref<1x3x8x128xf32, #tpu.memory_space<vmem>>, %arg5: memref<8x128xf32, #tpu.memory_space<vmem>>, %arg6: memref<8x128xf32, #tpu.memory_space<vmem>>, %arg7: memref<8x128xf32, #tpu.memory_space<vmem>>) attributes {dimension_semantics = [#tpu.dimension_semantics<parallel>, #tpu.dimension_semantics<arbitrary>], iteration_bounds = array<i64: 1, 1>, scalar_prefetch = 0 : i64, scratch_operands = 3 : i64, tpu.core_type = #tpu.core_type<tc>, window_params = [{transform_indices = @transform_0, window_bounds = array<i64: 16, 128>}, {transform_indices = @transform_1, window_bounds = array<i64: 16, 128>}, {transform_indices = @transform_2, window_bounds = array<i64: 1, 3, 8, 128>}]} {
    %c0_i32 = arith.constant 0 : i32
    %0 = arith.cmpi eq, %arg1, %c0_i32 : i32
    %1 = arith.extui %0 : i1 to i32
    %c0_i32_0 = arith.constant 0 : i32
    %2 = arith.cmpi ne, %1, %c0_i32_0 : i32
    scf.if %2 {
      %cst_10 = arith.constant 0.000000e+00 : f32
      %23 = vector.broadcast %cst_10 : f32 to vector<8x128xf32>
      %c0_11 = arith.constant 0 : index
      %c0_12 = arith.constant 0 : index
      %24 = vector.load %arg5[%c0_11, %c0_12] : memref<8x128xf32, #tpu.memory_space<vmem>>, vector<8x128xf32>
      tpu.vector_store %arg5[%c0_11, %c0_12], %23 {strides = array<i32>} : memref<8x128xf32, #tpu.memory_space<vmem>>, vector<8x128xf32>,
      %cst_13 = arith.constant 0.000000e+00 : f32
      %25 = vector.broadcast %cst_13 : f32 to vector<8x128xf32>
      %c0_14 = arith.constant 0 : index
      %c0_15 = arith.constant 0 : index
      %26 = vector.load %arg6[%c0_14, %c0_15] : memref<8x128xf32, #tpu.memory_space<vmem>>, vector<8x128xf32>
      tpu.vector_store %arg6[%c0_14, %c0_15], %25 {strides = array<i32>} : memref<8x128xf32, #tpu.memory_space<vmem>>, vector<8x128xf32>,
      %cst_16 = arith.constant 0.000000e+00 : f32
      %27 = vector.broadcast %cst_16 : f32 to vector<8x128xf32>
      %c0_17 = arith.constant 0 : index
      %c0_18 = arith.constant 0 : index
      %28 = vector.load %arg7[%c0_17, %c0_18] : memref<8x128xf32, #tpu.memory_space<vmem>>, vector<8x128xf32>
      tpu.vector_store %arg7[%c0_17, %c0_18], %27 {strides = array<i32>} : memref<8x128xf32, #tpu.memory_space<vmem>>, vector<8x128xf32>,
    } else {
    }
    %c0 = arith.constant 0 : index
    %c0_1 = arith.constant 0 : index
    %3 = vector.load %arg3[%c0, %c0_1] : memref<16x128xf32, #tpu.memory_space<vmem>>, vector<16x128xf32>
    %c0_2 = arith.constant 0 : index
    %c0_3 = arith.constant 0 : index
    %4 = vector.load %arg2[%c0_2, %c0_3] : memref<16x128xf32, #tpu.memory_space<vmem>>, vector<16x128xf32>
    %5 = vector.shape_cast %3 : vector<16x128xf32> to vector<2x8x128xf32>
    %6 = vector.shape_cast %4 : vector<16x128xf32> to vector<2x8x128xf32>
    %7 = arith.subf %6, %5 : vector<2x8x128xf32>
    %cst = arith.constant 9.99999997E-7 : f32
    %8 = vector.broadcast %cst : f32 to vector<2x8x128xf32>
    %9 = arith.addf %7, %8 : vector<2x8x128xf32>
    %c1_i32 = arith.constant 1 : i32
    %10 = arith.muli %arg0, %c1_i32 : i32
    %11 = arith.addi %10, %arg1 : i32
    %c2048_i32 = arith.constant 2048 : i32
    %12 = arith.muli %11, %c2048_i32 : i32
    %c2048_i32_4 = arith.constant 2048 : i32
    %13 = arith.addi %12, %c2048_i32_4 : i32
    %c2048_i32_5 = arith.constant 2048 : i32
    %14 = arith.cmpi sgt, %13, %c2048_i32_5 : i32
    %true = arith.constant true
    %15 = arith.xori %14, %true : i1
    %16 = arith.extui %15 : i1 to i32
    %c0_i32_6 = arith.constant 0 : i32
    %17 = arith.cmpi ne, %16, %c0_i32_6 : i32
    scf.if %17 {
      %c0_10 = arith.constant 0 : index
      %c0_11 = arith.constant 0 : index
      %23 = vector.load %arg5[%c0_10, %c0_11] : memref<8x128xf32, #tpu.memory_space<vmem>>, vector<8x128xf32>
      %cst_12 = arith.constant dense<0.000000e+00> : vector<8x128xf32>
      %24 = vector.multi_reduction <add>, %5, %cst_12 [0] : vector<2x8x128xf32> to vector<8x128xf32>
      %25 = arith.addf %23, %24 : vector<8x128xf32>
      %c0_13 = arith.constant 0 : index
      %c0_14 = arith.constant 0 : index
      %26 = vector.load %arg5[%c0_13, %c0_14] : memref<8x128xf32, #tpu.memory_space<vmem>>, vector<8x128xf32>
      tpu.vector_store %arg5[%c0_13, %c0_14], %25 {strides = array<i32>} : memref<8x128xf32, #tpu.memory_space<vmem>>, vector<8x128xf32>,
      %c0_15 = arith.constant 0 : index
      %c0_16 = arith.constant 0 : index
      %27 = vector.load %arg6[%c0_15, %c0_16] : memref<8x128xf32, #tpu.memory_space<vmem>>, vector<8x128xf32>
      %28 = arith.mulf %5, %5 : vector<2x8x128xf32>
      %cst_17 = arith.constant dense<0.000000e+00> : vector<8x128xf32>
      %29 = vector.multi_reduction <add>, %28, %cst_17 [0] : vector<2x8x128xf32> to vector<8x128xf32>
      %30 = arith.addf %27, %29 : vector<8x128xf32>
      %c0_18 = arith.constant 0 : index
      %c0_19 = arith.constant 0 : index
      %31 = vector.load %arg6[%c0_18, %c0_19] : memref<8x128xf32, #tpu.memory_space<vmem>>, vector<8x128xf32>
      tpu.vector_store %arg6[%c0_18, %c0_19], %30 {strides = array<i32>} : memref<8x128xf32, #tpu.memory_space<vmem>>, vector<8x128xf32>,
      %c0_20 = arith.constant 0 : index
      %c0_21 = arith.constant 0 : index
      %32 = vector.load %arg7[%c0_20, %c0_21] : memref<8x128xf32, #tpu.memory_space<vmem>>, vector<8x128xf32>
      %33 = arith.mulf %9, %9 : vector<2x8x128xf32>
      %cst_22 = arith.constant dense<0.000000e+00> : vector<8x128xf32>
      %34 = vector.multi_reduction <add>, %33, %cst_22 [0] : vector<2x8x128xf32> to vector<8x128xf32>
      %35 = arith.addf %32, %34 : vector<8x128xf32>
      %c0_23 = arith.constant 0 : index
      %c0_24 = arith.constant 0 : index
      %36 = vector.load %arg7[%c0_23, %c0_24] : memref<8x128xf32, #tpu.memory_space<vmem>>, vector<8x128xf32>
      tpu.vector_store %arg7[%c0_23, %c0_24], %35 {strides = array<i32>} : memref<8x128xf32, #tpu.memory_space<vmem>>, vector<8x128xf32>,
    } else {
    }
    %18 = arith.extui %14 : i1 to i32
    %c0_i32_7 = arith.constant 0 : i32
    %19 = arith.cmpi ne, %18, %c0_i32_7 : i32
    scf.if %19 {
      %23 = tpu.iota {dimensions = array<i32: 0>} : vector<2x8x128xi32>
      %24 = tpu.iota {dimensions = array<i32: 1>} : vector<2x8x128xi32>
      %25 = tpu.iota {dimensions = array<i32: 2>} : vector<2x8x128xi32>
      %c8_i32 = arith.constant 8 : i32
      %26 = vector.broadcast %c8_i32 : i32 to vector<2x8x128xi32>
      %27 = arith.muli %23, %26 : vector<2x8x128xi32>
      %28 = arith.addi %27, %24 : vector<2x8x128xi32>
      %c128_i32 = arith.constant 128 : i32
      %29 = vector.broadcast %c128_i32 : i32 to vector<2x8x128xi32>
      %30 = arith.muli %28, %29 : vector<2x8x128xi32>
      %31 = vector.broadcast %12 : i32 to vector<2x8x128xi32>
      %32 = arith.addi %31, %30 : vector<2x8x128xi32>
      %33 = arith.addi %32, %25 : vector<2x8x128xi32>
      %c2048_i32_10 = arith.constant 2048 : i32
      %34 = vector.broadcast %c2048_i32_10 : i32 to vector<2x8x128xi32>
      %35 = arith.cmpi slt, %33, %34 : vector<2x8x128xi32>
      %c0_11 = arith.constant 0 : index
      %c0_12 = arith.constant 0 : index
      %36 = vector.load %arg5[%c0_11, %c0_12] : memref<8x128xf32, #tpu.memory_space<vmem>>, vector<8x128xf32>
      %cst_13 = arith.constant 0.000000e+00 : f32
      %37 = vector.broadcast %cst_13 : f32 to vector<2x8x128xf32>
      %38 = arith.select %35, %5, %37 : vector<2x8x128xi1>, vector<2x8x128xf32>
      %cst_14 = arith.constant dense<0.000000e+00> : vector<8x128xf32>
      %39 = vector.multi_reduction <add>, %38, %cst_14 [0] : vector<2x8x128xf32> to vector<8x128xf32>
      %40 = arith.addf %36, %39 : vector<8x128xf32>
      %c0_15 = arith.constant 0 : index
      %c0_16 = arith.constant 0 : index
      %41 = vector.load %arg5[%c0_15, %c0_16] : memref<8x128xf32, #tpu.memory_space<vmem>>, vector<8x128xf32>
      tpu.vector_store %arg5[%c0_15, %c0_16], %40 {strides = array<i32>} : memref<8x128xf32, #tpu.memory_space<vmem>>, vector<8x128xf32>,
      %c0_17 = arith.constant 0 : index
      %c0_18 = arith.constant 0 : index
      %42 = vector.load %arg6[%c0_17, %c0_18] : memref<8x128xf32, #tpu.memory_space<vmem>>, vector<8x128xf32>
      %43 = arith.mulf %5, %5 : vector<2x8x128xf32>
      %cst_19 = arith.constant 0.000000e+00 : f32
      %44 = vector.broadcast %cst_19 : f32 to vector<2x8x128xf32>
      %45 = arith.select %35, %43, %44 : vector<2x8x128xi1>, vector<2x8x128xf32>
      %cst_20 = arith.constant dense<0.000000e+00> : vector<8x128xf32>
      %46 = vector.multi_reduction <add>, %45, %cst_20 [0] : vector<2x8x128xf32> to vector<8x128xf32>
      %47 = arith.addf %42, %46 : vector<8x128xf32>
      %c0_21 = arith.constant 0 : index
      %c0_22 = arith.constant 0 : index
      %48 = vector.load %arg6[%c0_21, %c0_22] : memref<8x128xf32, #tpu.memory_space<vmem>>, vector<8x128xf32>
      tpu.vector_store %arg6[%c0_21, %c0_22], %47 {strides = array<i32>} : memref<8x128xf32, #tpu.memory_space<vmem>>, vector<8x128xf32>,
      %c0_23 = arith.constant 0 : index
      %c0_24 = arith.constant 0 : index
      %49 = vector.load %arg7[%c0_23, %c0_24] : memref<8x128xf32, #tpu.memory_space<vmem>>, vector<8x128xf32>
      %50 = arith.mulf %9, %9 : vector<2x8x128xf32>
      %cst_25 = arith.constant 0.000000e+00 : f32
      %51 = vector.broadcast %cst_25 : f32 to vector<2x8x128xf32>
      %52 = arith.select %35, %50, %51 : vector<2x8x128xi1>, vector<2x8x128xf32>
      %cst_26 = arith.constant dense<0.000000e+00> : vector<8x128xf32>
      %53 = vector.multi_reduction <add>, %52, %cst_26 [0] : vector<2x8x128xf32> to vector<8x128xf32>
      %54 = arith.addf %49, %53 : vector<8x128xf32>
      %c0_27 = arith.constant 0 : index
      %c0_28 = arith.constant 0 : index
      %55 = vector.load %arg7[%c0_27, %c0_28] : memref<8x128xf32, #tpu.memory_space<vmem>>, vector<8x128xf32>
      tpu.vector_store %arg7[%c0_27, %c0_28], %54 {strides = array<i32>} : memref<8x128xf32, #tpu.memory_space<vmem>>, vector<8x128xf32>,
    } else {
    }
    %c0_i32_8 = arith.constant 0 : i32
    %20 = arith.cmpi eq, %arg1, %c0_i32_8 : i32
    %21 = arith.extui %20 : i1 to i32
    %c0_i32_9 = arith.constant 0 : i32
    %22 = arith.cmpi ne, %21, %c0_i32_9 : i32
    scf.if %22 {
      %c0_10 = arith.constant 0 : index
      %c0_11 = arith.constant 0 : index
      %23 = vector.load %arg5[%c0_10, %c0_11] : memref<8x128xf32, #tpu.memory_space<vmem>>, vector<8x128xf32>
      %c0_12 = arith.constant 0 : index
      %c0_13 = arith.constant 0 : index
      %c0_14 = arith.constant 0 : index
      %c0_15 = arith.constant 0 : index
      %24 = vector.load %arg4[%c0_12, %c0_13, %c0_14, %c0_15] : memref<1x3x8x128xf32, #tpu.memory_space<vmem>>, vector<1x1x8x128xf32>
      %25 = vector.shape_cast %24 : vector<1x1x8x128xf32> to vector<8x128xf32>
      %26 = vector.shape_cast %23 : vector<8x128xf32> to vector<1x1x8x128xf32>
      tpu.vector_store %arg4[%c0_12, %c0_13, %c0_14, %c0_15], %26 {strides = array<i32>} : memref<1x3x8x128xf32, #tpu.memory_space<vmem>>, vector<1x1x8x128xf32>,
      %c0_16 = arith.constant 0 : index
      %c0_17 = arith.constant 0 : index
      %27 = vector.load %arg6[%c0_16, %c0_17] : memref<8x128xf32, #tpu.memory_space<vmem>>, vector<8x128xf32>
      %c0_18 = arith.constant 0 : index
      %c1 = arith.constant 1 : index
      %c0_19 = arith.constant 0 : index
      %c0_20 = arith.constant 0 : index
      %28 = vector.load %arg4[%c0_18, %c1, %c0_19, %c0_20] : memref<1x3x8x128xf32, #tpu.memory_space<vmem>>, vector<1x1x8x128xf32>
      %29 = vector.shape_cast %28 : vector<1x1x8x128xf32> to vector<8x128xf32>
      %30 = vector.shape_cast %27 : vector<8x128xf32> to vector<1x1x8x128xf32>
      tpu.vector_store %arg4[%c0_18, %c1, %c0_19, %c0_20], %30 {strides = array<i32>} : memref<1x3x8x128xf32, #tpu.memory_space<vmem>>, vector<1x1x8x128xf32>,
      %c0_21 = arith.constant 0 : index
      %c0_22 = arith.constant 0 : index
      %31 = vector.load %arg7[%c0_21, %c0_22] : memref<8x128xf32, #tpu.memory_space<vmem>>, vector<8x128xf32>
      %c0_23 = arith.constant 0 : index
      %c2 = arith.constant 2 : index
      %c0_24 = arith.constant 0 : index
      %c0_25 = arith.constant 0 : index
      %32 = vector.load %arg4[%c0_23, %c2, %c0_24, %c0_25] : memref<1x3x8x128xf32, #tpu.memory_space<vmem>>, vector<1x1x8x128xf32>
      %33 = vector.shape_cast %32 : vector<1x1x8x128xf32> to vector<8x128xf32>
      %34 = vector.shape_cast %31 : vector<8x128xf32> to vector<1x1x8x128xf32>
      tpu.vector_store %arg4[%c0_23, %c2, %c0_24, %c0_25], %34 {strides = array<i32>} : memref<1x3x8x128xf32, #tpu.memory_space<vmem>>, vector<1x1x8x128xf32>,
    } else {
    }
    return
  }
  func.func @transform_0(%arg0: i32, %arg1: i32) -> (i32, i32) {
    %c1_i32 = arith.constant 1 : i32
    %0 = arith.muli %arg0, %c1_i32 : i32
    %1 = arith.addi %0, %arg1 : i32
    %c0_i32 = arith.constant 0 : i32
    %c0_i32_0 = arith.constant 0 : i32
    return %1, %c0_i32 : i32, i32
  }
  func.func @transform_1(%arg0: i32, %arg1: i32) -> (i32, i32) {
    %c1_i32 = arith.constant 1 : i32
    %0 = arith.muli %arg0, %c1_i32 : i32
    %1 = arith.addi %0, %arg1 : i32
    %c0_i32 = arith.constant 0 : i32
    %c0_i32_0 = arith.constant 0 : i32
    return %1, %c0_i32 : i32, i32
  }
  func.func @transform_2(%arg0: i32, %arg1: i32) -> (i32, i32, i32, i32) {
    %c0_i32 = arith.constant 0 : i32
    %c0_i32_0 = arith.constant 0 : i32
    %c0_i32_1 = arith.constant 0 : i32
    %c0_i32_2 = arith.constant 0 : i32
    return %arg0, %c0_i32, %c0_i32_0, %c0_i32_1 : i32, i32, i32, i32
  }
}

</mosaic_0001>

<bundles_post_ra>
// kernel: r2_loss.1
= control target key start
LH: loop header
LB: loop body
LE: loop exit
PB: predicated region body
PF: predicated region fallthrough
CT: control target
= control target key end

     0   :  { %s198_s1 = inlined_call_operand.vmem [shape: f32[16,128], index: 1, kind: input, shape index: {}]   ;;  %s199_s0 = inlined_call_operand.vmem [shape: f32[16,128], index: 0, kind: input, shape index: {}]   ;;  %s200_s2 = inlined_call_operand.vmem [shape: f32[1,3,8,128], index: 2, kind: output, shape index: {}]  }
   0x1   :  { %v62_v0 = vld [vmem:[%s198_s1] sm:$0xff]  ;;  %v63_v1 = vld [vmem:[%s198_s1 + $0x8] sm:$0xff] }
   0x2   :  { %v64_v2 = vld [vmem:[%s199_s0] sm:$0xff]  ;;  %v79_v3 = vadd.f32 %v63_v1, %v62_v0  ;;  %v83_v4 = vmul.f32 %v62_v0, %v62_v0  ;;  %v84_v5 = vmul.f32 %v63_v1, %v63_v1  ;;  %v65_v6 = vld [vmem:[%s199_s0 + $0x8] sm:$0xff] }
   0x3   :  { %v66_v7 = vsub.f32 %v64_v2, %v62_v0  ;;  %v67_v8 = vsub.f32 %v65_v6, %v63_v1 }
   0x4   :  { %137 = vst [vmem:[%s200_s2] sm:$0xff] %v79_v3  ;;  %v85_v9 = vadd.f32 %v84_v5, %v83_v4 }
   0x5   :  { %v68_v10 = vadd.f32 1e-06, %v66_v7  ;;  %v69_v11 = vadd.f32 1e-06, %v67_v8 }
   0x6   :  { %160 = vst [vmem:[%s200_s2 + $0x8] sm:$0xff] %v85_v9 }
   0x7   :  { %v89_v12 = vmul.f32 %v68_v10, %v68_v10  ;;  %v90_v13 = vmul.f32 %v69_v11, %v69_v11 }
   0x9   :  { %v91_v14 = vadd.f32 %v90_v13, %v89_v12 }
   0xb   :  { %161 = vst [vmem:[%s200_s2 + $0x10] sm:$0xff] %v91_v14 }

</bundles_post_ra>
